<compile_context>
chip_gen: v7x
topology: tpu7x:2x2x1
jax: 0.10.0
libtpu: 0.0.40
codegen_flags: <defaults>
</compile_context>

<pallas_src>
import functools

import jax
import jax.numpy as jnp
from jax.experimental import pallas as pl
from jax.experimental.pallas import tpu as pltpu


def _round_up(x, m):
    return (x + m - 1) // m * m


def _patch_embed_kernel(x_ref, w_ref, b_ref, o_ref):
    # x_ref: (TM, K) bf16, w_ref: (K, TE) bf16, b_ref: (1, TE) f32,
    # o_ref: (TM, TE) out_dtype.  MXU matmul, f32 accumulation, bias in f32.
    acc = jnp.dot(x_ref[...], w_ref[...], preferred_element_type=jnp.float32)
    o_ref[...] = (acc + b_ref[...]).astype(o_ref.dtype)


# VMEM budget used for tile-size selection.  Chosen for the smallest VMEM
# generation (v7x: 64 MiB physical, 32 MiB scoped default); v5e/v6e have
# 128 MiB so this is conservative there too.
_VMEM_BUDGET = 24 << 20


def _pick_tm(m, k, te, out_bytes):
    """Largest M-tile that fits the VMEM budget; prefer one dividing M."""
    m8 = _round_up(max(m, 1), 8)
    w_bytes = 2 * k * te * 2                        # worst case: double-buffered
    candidates = [c for c in (2048, 1024, 512, 256, 128, 64, 32, 16, 8) if c <= m8]
    if not candidates:
        candidates = [m8]

    def fits(tm):
        return (2 * tm * k * 2            # x double-buffered, bf16
                + w_bytes                 # weights
                + 2 * tm * te * out_bytes # out double-buffered
                + 4 * te) <= _VMEM_BUDGET

    fitting = [c for c in candidates if fits(c)] or [candidates[-1]]
    for c in fitting:                      # largest fitting tile dividing M
        if m % c == 0:
            return c, m                    # no pad copy of xmat needed
    tm = fitting[0]
    return tm, _round_up(m, tm)


def patch_embed_pallas(x, weight, bias, *, patch_size, tubelet_size,
                       out_dtype=jnp.bfloat16):
    """Pallas implementation of PatchEmbed.forward.

    x:      (B, C, T, H, W)
    weight: (E, C, tubelet, p, p)
    bias:   (E,)
    returns (tokens (B, N, E) in `out_dtype`, Hp, Wp)

    NOTE: `out_dtype` defaults to bfloat16 (explicit API decision — halves the
    output HBM write stream).  Pass out_dtype=x.dtype for dtype-preserving
    behaviour.  Matmul inputs are bf16 with f32 accumulation.
    """
    B, C, T, H, W = x.shape
    E = weight.shape[0]
    p, tub = patch_size, tubelet_size
    Tp, Hp, Wp = T // tub, H // p, W // p
    N = Tp * Hp * Wp
    K = C * tub * p * p
    M = B * N
    out_bytes = jnp.dtype(out_dtype).itemsize

    # --- glue: patchify in bf16 (halves the XLA transpose HBM pass) ---
    xb = x.astype(jnp.bfloat16)
    xpch = xb.reshape(B, C, Tp, tub, Hp, p, Wp, p)
    xpch = xpch.transpose(0, 2, 4, 6, 1, 3, 5, 7)       # (B,Tp,Hp,Wp,C,tub,p,p)
    xmat = xpch.reshape(M, K)                            # K unpadded (full-dim block)

    wmat = weight.reshape(E, K).T.astype(jnp.bfloat16)   # (K, E), (C,t,h,w) order
    bvec = bias.reshape(1, E).astype(jnp.float32)

    # --- E padding: lane-dense output (128; 256 for the 256-wide MXUs) ---
    e_align = 256 if E >= 256 else 128
    E_pad = _round_up(E, e_align)
    if E_pad != E:
        wmat = jnp.pad(wmat, ((0, 0), (0, E_pad - E)))
        bvec = jnp.pad(bvec, ((0, 0), (0, E_pad - E)))

    w_vmem = 2 * K * E_pad * 2   # worst-case double-buffered weight footprint

    if w_vmem <= _VMEM_BUDGET // 2:
        # Default path: W fully VMEM-resident, single grid axis over M.
        TE = E_pad
        TM, M_pad = _pick_tm(M, K, TE, out_bytes)
        if M_pad != M:
            xmat = jnp.pad(xmat, ((0, M_pad - M), (0, 0)))
        grid = (M_pad // TM,)
        in_specs = [
            pl.BlockSpec((TM, K), lambda i: (i, 0)),     # X tile, streamed over M
            pl.BlockSpec((K, TE), lambda i: (0, 0)),     # W resident (fetched once)
            pl.BlockSpec((1, TE), lambda i: (0, 0)),     # bias resident
        ]
        out_specs = pl.BlockSpec((TM, TE), lambda i: (i, 0))
        dims = ("parallel",)
    else:
        # Large K*E fallback: tile E, with E as the OUTER axis so the W tile
        # is only re-fetched once per E tile (not once per M tile).
        TE = next(c for c in (512, 256, 128) if c <= E_pad and E_pad % c == 0)
        TM, M_pad = _pick_tm(M, K, TE, out_bytes)
        if M_pad != M:
            xmat = jnp.pad(xmat, ((0, M_pad - M), (0, 0)))
        grid = (E_pad // TE, M_pad // TM)
        in_specs = [
            pl.BlockSpec((TM, K), lambda j, i: (i, 0)),
            pl.BlockSpec((K, TE), lambda j, i: (0, j)),
            pl.BlockSpec((1, TE), lambda j, i: (0, j)),
        ]
        out_specs = pl.BlockSpec((TM, TE), lambda j, i: (i, j))
        dims = ("parallel", "parallel")

    # VMEM limit from the actual tile footprint (headroom x2, capped under the
    # v7x physical 64 MiB so the same code is portable across generations).
    est = 2 * TM * K * 2 + 2 * K * TE * 2 + 2 * TM * TE * out_bytes + 4 * TE
    vmem_limit = int(min(64 << 20, max(2 * est, 16 << 20)))

    cost = pl.CostEstimate(
        flops=2 * M_pad * K * E_pad,
        transcendentals=0,
        bytes_accessed=(M_pad * K * 2 + K * E_pad * 2
                        + M_pad * E_pad * out_bytes + E_pad * 4),
    )

    out = pl.pallas_call(
        _patch_embed_kernel,
        out_shape=jax.ShapeDtypeStruct((M_pad, E_pad), out_dtype),
        grid=grid,
        in_specs=in_specs,
        out_specs=out_specs,
        compiler_params=pltpu.CompilerParams(
            dimension_semantics=dims,
            vmem_limit_bytes=vmem_limit),
        cost_estimate=cost,
    )(xmat, wmat, bvec)

    # Slice/reshape only (no dtype cast pass); no-op slice when unpadded.
    tokens = out[:M, :E].reshape(B, N, E)
    # norm_layer is None in the reference config -> nn.Identity (no-op).
    return tokens, Hp, Wp


if __name__ == "__main__":
    # Small config consistent with the module:
    # img_size=16, patch_size=8, num_frames=2, tubelet_size=1,
    # in_chans=4, embed_dim=32  -> grid (2, 2, 2), num_patches = 8
    B, C, T, H, W = 2, 4, 2, 16, 16
    p, tub, E = 8, 1, 32

    key = jax.random.PRNGKey(0)
    kx, kw, kb = jax.random.split(key, 3)
    x = jax.random.normal(kx, (B, C, T, H, W), dtype=jnp.float32)
    weight = jax.random.normal(kw, (E, C, tub, p, p), dtype=jnp.float32) * 0.02
    bias = jax.random.normal(kb, (E,), dtype=jnp.float32) * 0.02

    fn = jax.jit(functools.partial(patch_embed_pallas,
                                   patch_size=p, tubelet_size=tub))
    tokens, Hp, Wp = fn(x, weight, bias)
    tokens = jax.block_until_ready(tokens)

    # Reference check (plain JAX f32 conv == strided Conv3d of PyTorch).
    ref = jax.lax.conv_general_dilated(
        x, weight,
        window_strides=(tub, p, p), padding="VALID",
        dimension_numbers=("NCDHW", "OIDHW", "NCDHW"),
    ) + bias.reshape(1, E, 1, 1, 1)
    ref_tokens = ref.reshape(B, E, -1).transpose(0, 2, 1)

    assert tokens.shape == (B, (T // tub) * (H // p) * (W // p), E)
    assert Hp == H // p and Wp == W // p
    assert tokens.dtype == jnp.bfloat16
    # bf16 matmul inputs / bf16 output (f32 accumulation) -> relaxed tolerance.
    assert jnp.allclose(tokens.astype(jnp.float32), ref_tokens,
                        atol=2e-2, rtol=2e-2)

    print("KERNEL_OK")
</pallas_src>

<mosaic_0001>
module attributes {stable_mosaic.version = 11 : i64} {
  func.func @_patch_embed_kernel(%arg0: i32, %arg1: memref<16x256xbf16, #tpu.memory_space<vmem>>, %arg2: memref<256x128xbf16, #tpu.memory_space<vmem>>, %arg3: memref<1x128xf32, #tpu.memory_space<vmem>>, %arg4: memref<16x128xbf16, #tpu.memory_space<vmem>>) attributes {dimension_semantics = [#tpu.dimension_semantics<parallel>], iteration_bounds = array<i64: 1>, scalar_prefetch = 0 : i64, scratch_operands = 0 : i64, tpu.core_type = #tpu.core_type<tc>, window_params = [{transform_indices = @transform_0, window_bounds = array<i64: 16, 256>}, {pipeline_mode = #tpu.pipeline_mode<synchronous>, transform_indices = @transform_1, window_bounds = array<i64: 256, 128>}, {pipeline_mode = #tpu.pipeline_mode<synchronous>, transform_indices = @transform_2, window_bounds = array<i64: 1, 128>}, {transform_indices = @transform_3, window_bounds = array<i64: 16, 128>}]} {
    %c0 = arith.constant 0 : index
    %c0_0 = arith.constant 0 : index
    %0 = vector.load %arg1[%c0, %c0_0] : memref<16x256xbf16, #tpu.memory_space<vmem>>, vector<16x256xbf16>
    %c0_1 = arith.constant 0 : index
    %c0_2 = arith.constant 0 : index
    %1 = vector.load %arg2[%c0_1, %c0_2] : memref<256x128xbf16, #tpu.memory_space<vmem>>, vector<256x128xbf16>
    %cst = arith.constant dense<0.000000e+00> : vector<16x128xf32>
    %2 = tpu.matmul %0, %1, %cst {dimension_numbers = #tpu.dot_dimension_numbers<[1], [0], [0], [1], [0, 0, 1, 1], [], []>} : vector<16x256xbf16>, vector<256x128xbf16>, vector<16x128xf32> -> vector<16x128xf32>
    %c0_3 = arith.constant 0 : index
    %c0_4 = arith.constant 0 : index
    %3 = vector.load %arg3[%c0_3, %c0_4] : memref<1x128xf32, #tpu.memory_space<vmem>>, vector<1x128xf32>
    %4 = vector.broadcast %3 : vector<1x128xf32> to vector<16x128xf32>
    %5 = arith.addf %2, %4 : vector<16x128xf32>
    %6 = arith.truncf %5 : vector<16x128xf32> to vector<16x128xbf16>
    %c0_5 = arith.constant 0 : index
    %c0_6 = arith.constant 0 : index
    %7 = vector.load %arg4[%c0_5, %c0_6] : memref<16x128xbf16, #tpu.memory_space<vmem>>, vector<16x128xbf16>
    tpu.vector_store %arg4[%c0_5, %c0_6], %6 {strides = array<i32>} : memref<16x128xbf16, #tpu.memory_space<vmem>>, vector<16x128xbf16>,
    return
  }
  func.func @transform_0(%arg0: i32) -> (i32, i32) {
    %c0_i32 = arith.constant 0 : i32
    %c0_i32_0 = arith.constant 0 : i32
    return %arg0, %c0_i32 : i32, i32
  }
  func.func @transform_1(%arg0: i32) -> (i32, i32) {
    %c0_i32 = arith.constant 0 : i32
    %c0_i32_0 = arith.constant 0 : i32
    %c0_i32_1 = arith.constant 0 : i32
    return %c0_i32, %c0_i32_0 : i32, i32
  }
  func.func @transform_2(%arg0: i32) -> (i32, i32) {
    %c0_i32 = arith.constant 0 : i32
    %c0_i32_0 = arith.constant 0 : i32
    %c0_i32_1 = arith.constant 0 : i32
    return %c0_i32, %c0_i32_0 : i32, i32
  }
  func.func @transform_3(%arg0: i32) -> (i32, i32) {
    %c0_i32 = arith.constant 0 : i32
    %c0_i32_0 = arith.constant 0 : i32
    return %arg0, %c0_i32 : i32, i32
  }
}

</mosaic_0001>

<bundles_post_ra>
// kernel: patch_embed_pallas.1
= control target key start
LH: loop header
LB: loop body
LE: loop exit
PB: predicated region body
PF: predicated region fallthrough
CT: control target
= control target key end

     0   :  { %s366_s1 = inlined_call_operand.vmem [shape: bf16[256,128], index: 1, kind: input, shape index: {}]   ;;  %s367_s0 = inlined_call_operand.vmem [shape: bf16[16,256], index: 0, kind: input, shape index: {}]   ;;  %s368_s2 = inlined_call_operand.vmem [shape: f32[1,128], index: 2, kind: input, shape index: {}]   ;;  %s369_s3 = inlined_call_operand.vmem [shape: bf16[16,128], index: 3, kind: output, shape index: {}]  }
   0x1   :  { %v267_v0 = vld [vmem:[%s366_s1 + $0x40] sm:$0xff]   ;;  %v269_v2 = vld [vmem:[%s366_s1 + $0x48] sm:$0xff]   ;;  %v271_v4 = vld [vmem:[%s366_s1 + $0x50] sm:$0xff]  }
   0x2   :  { %v268_v1 = vld [vmem:[%s366_s1] sm:$0xff]   ;;  %245 = vmatprep.subr.bf16.mxu0 %v267_v0  ;;  %v270_v3 = vld [vmem:[%s366_s1 + $0x8] sm:$0xff]   ;;  %v272_v5 = vld [vmem:[%s366_s1 + $0x10] sm:$0xff]  }
   0x3   :  { %246 = vmatpush3.bf16.msra.mxu0 %v268_v1  ;;  %v273_v6 = vld [vmem:[%s366_s1 + $0x58] sm:$0xff]   ;;  %v275_v8 = vld [vmem:[%s366_s1 + $0x60] sm:$0xff]   ;;  %v277_v10 = vld [vmem:[%s366_s1 + $0x68] sm:$0xff]  }
   0x4   :  { %247 = vmatprep.subr.bf16.mxu0 %v269_v2  ;;  %v274_v7 = vld [vmem:[%s366_s1 + $0x18] sm:$0xff]   ;;  %v276_v9 = vld [vmem:[%s366_s1 + $0x20] sm:$0xff]   ;;  %v278_v12 = vld [vmem:[%s366_s1 + $0x28] sm:$0xff]  }
   0x5   :  { %v285_v11 = vld [vmem:[%s367_s0 + $0x4] ss:$8 sps:$4 sm:$0xff]   ;;  %v279_v13 = vld [vmem:[%s366_s1 + $0x70] sm:$0xff]   ;;  %v281_v15 = vld [vmem:[%s366_s1 + $0x78] sm:$0xff]  }
   0x6   :  { %194 = vmatprep.mubr.bf16.mxu0 %v285_v11  ;;  %v280_v14 = vld [vmem:[%s366_s1 + $0x30] sm:$0xff]   ;;  %v282_v16 = vld [vmem:[%s366_s1 + $0x38] sm:$0xff]   ;;  %v283_v17 = vld [vmem:[%s367_s0] ss:$8 sps:$4 sm:$0xff]  }
   0x7   :  { %248 = vmatpush3.bf16.msra.mxu0 %v270_v3  ;;  %v217_v22 = vld [vmem:[%s368_s2] ss:$0 sm:$0xff] }
   0x8   :  { %249 = vmatprep.subr.bf16.mxu0 %v271_v4 }
   0xb   :  { %250 = vmatpush3.bf16.msra.mxu0 %v272_v5 }
   0xc   :  { %251 = vmatprep.subr.bf16.mxu0 %v273_v6 }
   0xf   :  { %252 = vmatpush3.bf16.msra.mxu0 %v274_v7 }
  0x10   :  { %253 = vmatprep.subr.bf16.mxu0 %v275_v8 }
  0x13   :  { %254 = vmatpush3.bf16.msra.mxu0 %v276_v9 }
  0x14   :  { %255 = vmatprep.subr.bf16.mxu0 %v277_v10 }
  0x17   :  { %256 = vmatpush3.bf16.msra.mxu0 %v278_v12 }
  0x18   :  { %257 = vmatprep.subr.bf16.mxu0 %v279_v13 }
  0x1b   :  { %258 = vmatpush3.bf16.msra.mxu0 %v280_v14 }
  0x1c   :  { %259 = vmatprep.subr.bf16.mxu0 %v281_v15 }
  0x1f   :  { %260 = vmatpush3.bf16.msra.mxu0 %v282_v16 }
  0x22   :  { %195 = vmatmul.mubr.bf16.vlgmr.msra.gmra.mrb[0].mxu0 %v283_v17 }
  0xf5   :  { %v261_v18 = vpop.f32.mrb[0].mxu0 }
  0xf6   :  { %v262_v19 = vpop.f32.mrb[1].mxu0 }
  0xf7   :  { %v263_v20 = vadd.f32 %v262_v19, %v261_v18  ;;  %v264_v21 = vpop.f32.mrb[2].mxu0 }
  0xf8   :  { %v265_v23 = vpop.f32.mrb[3].mxu0 }
  0xf9   :  { %v266_v24 = vadd.f32 %v265_v23, %v264_v21  ;;  %v197_v25 = vadd.f32 %v263_v20, %v217_v22 }
  0xfb   :  { %v200_v26 = vadd.f32 %v266_v24, %v217_v22 }
  0xfd   :  { %v243_v27 = vpack.c.bf16 %v200_v26, %v197_v25 }
  0xff   :  { %244 = vst [vmem:[%s369_s3] sm:$0xff] %v243_v27  }

</bundles_post_ra>
